<compile_context>
chip_gen: v6e
topology: v6e:2x2x1
jax: 0.10.0
libtpu: 0.0.40
codegen_flags: <defaults>
</compile_context>

<pallas_src>
import functools

import jax
import jax.numpy as jnp
from jax.experimental import pallas as pl
from jax.experimental.pallas import tpu as pltpu


# ------------------------------ helpers ------------------------------------

def _im2col_nchw(x, kh, kw, sh, sw):
    """NCHW -> [N, C*kh*kw, Ho*Wo] patch matrix, *transpose-free* (padding=0).

    The channel-major patch ordering matches w.reshape(Cout, Cin*kh*kw), so the
    fused matmul below consumes it directly and the output stays NCHW.
    """
    N, C, H, W = x.shape
    Ho = (H - kh) // sh + 1
    Wo = (W - kw) // sw + 1
    cols = []
    for i in range(kh):
        for j in range(kw):
            cols.append(x[:, :, i:i + sh * Ho:sh, j:j + sw * Wo:sw])  # [N,C,Ho,Wo]
    col = jnp.stack(cols, axis=2)                     # [N, C, kh*kw, Ho, Wo]
    return col.reshape(N, C * kh * kw, Ho * Wo)


def _choose_spatial_tile(n_batch, P, K, Cout, w_bytes, budget=48 * 1024 * 1024):
    """Largest lane-dense spatial tile dividing P that fits the VMEM budget."""
    def need(tp):
        # double-buffered activation/output blocks + weight/bias + headroom
        return 2 * (K * tp * 4 + Cout * tp * 4) + 2 * (w_bytes + Cout * 4) + (4 << 20)

    if P % 128 == 0:
        cands = sorted((t for t in range(128, min(P, 8192) + 1, 128) if P % t == 0),
                       reverse=True)
    else:
        cands = [P]   # single full-extent lane block; avoids padding P in HBM
    if n_batch == 1:
        multi = [t for t in cands if P // t >= 2]
        if multi:
            cands = multi        # keep >=2 grid steps so v7x's 2nd core gets work
    for tp in cands:
        if need(tp) <= budget:
            return tp, need(tp)
    tp = cands[-1]
    return tp, need(tp)


# ----------------------------- Pallas kernel --------------------------------

def _conv_bn_act_kernel(x_ref, w_ref, b_ref, o_ref, *, apply_relu):
    # x_ref: (1, K, TP) f32 | w_ref: (Cout, K) bf16 | b_ref: (Cout, 1) f32
    # o_ref: (1, Cout, TP) f32
    xb = x_ref[0].astype(w_ref.dtype)                          # f32 -> bf16 (VPU)
    y = jnp.dot(w_ref[...], xb, preferred_element_type=jnp.float32)  # MXU, f32 acc
    y = y + b_ref[...]                                         # lane-broadcast bias
    if apply_relu:
        y = jnp.maximum(y, 0.0)
    o_ref[0] = y.astype(o_ref.dtype)


def _fused_matmul_bias_act(col, w_eff, b_eff, *, apply_relu):
    """out[n, :, p] = relu(w_eff @ col[n, :, p] + b_eff) for every batch/spatial tile."""
    N, K, P = col.shape
    Cout = w_eff.shape[0]
    w_bytes = w_eff.size * w_eff.dtype.itemsize
    tp, vmem_need = _choose_spatial_tile(N, P, K, Cout, w_bytes)

    kernel = functools.partial(_conv_bn_act_kernel, apply_relu=apply_relu)
    return pl.pallas_call(
        kernel,
        out_shape=jax.ShapeDtypeStruct((N, Cout, P), jnp.float32),
        grid_spec=pltpu.PrefetchScalarGridSpec(
            num_scalar_prefetch=0,
            grid=(N, P // tp),
            in_specs=[
                pl.BlockSpec((1, K, tp), lambda n, p: (n, 0, p)),   # streamed activations
                pl.BlockSpec((Cout, K), lambda n, p: (0, 0)),       # resident folded weight (bf16)
                pl.BlockSpec((Cout, 1), lambda n, p: (0, 0)),       # resident folded bias (f32)
            ],
            out_specs=pl.BlockSpec((1, Cout, tp), lambda n, p: (n, 0, p)),
        ),
        compiler_params=pltpu.CompilerParams(
            dimension_semantics=("parallel", "parallel"),   # batch & spatial independent
            vmem_limit_bytes=int(max(vmem_need, 16 * 1024 * 1024)),
        ),
    )(col, w_eff, b_eff)


# --------------------------- parameter handling ------------------------------

def fold_conv_bn_params(params, *, if_bn, eps=1e-5):
    """Fold conv bias + eval-mode BatchNorm into one (Cout, Cin*kh*kw) bf16 weight
    and a (Cout, 1) f32 bias.  No padding: Cout/K ride as full block dims."""
    w = params["w"]                                   # [Cout, Cin, kh, kw]
    b = params["b"]                                   # [Cout]
    Cout, Cin, kh, kw = w.shape
    K = Cin * kh * kw
    w2d = w.reshape(Cout, K)

    if if_bn:
        scale = params["gamma"] / jnp.sqrt(params["var"] + eps)
        shift = params["beta"] - params["mean"] * scale
    else:
        scale = jnp.ones((Cout,), w.dtype)
        shift = jnp.zeros((Cout,), w.dtype)

    w_eff = (w2d * scale[:, None]).astype(jnp.bfloat16)          # bf16 MXU input
    b_eff = (b * scale + shift).astype(jnp.float32).reshape(Cout, 1)
    return w_eff, b_eff


@functools.partial(jax.jit, static_argnames=("kernel_size", "stride", "apply_relu"))
def conv2d_forward(x, w_eff, b_eff, *, kernel_size, stride, apply_relu):
    """Fused Conv2d(+BN)(+ReLU). x: [N, C_in, H, W] -> [N, C_out, Ho, Wo] (NCHW kept)."""
    kh, kw = kernel_size
    sh, sw = stride
    N, C, H, W = x.shape
    Ho = (H - kh) // sh + 1
    Wo = (W - kw) // sw + 1
    Cout, K = w_eff.shape

    if (kh, kw) == (1, 1):
        xs = x if (sh, sw) == (1, 1) else x[:, :, ::sh, ::sw][:, :, :Ho, :Wo]
        col = xs.reshape(N, C, Ho * Wo)               # free reshape, no relayout
    else:
        # TODO(synk): replace HBM-materialized im2col with an in-kernel patch walk
        # (grid axis over kh*kw taps + f32 accumulator) to remove kh*kw amplification.
        col = _im2col_nchw(x, kh, kw, sh, sw)         # transpose-free im2col
    assert col.shape[1] == K

    y = _fused_matmul_bias_act(col, w_eff, b_eff, apply_relu=apply_relu)  # [N,Cout,Ho*Wo]
    return y.reshape(N, Cout, Ho, Wo)                 # free reshape, stays NCHW


def init_conv_bn_params(key, in_channel, out_channel, kernel_size):
    kh, kw = kernel_size
    fan_in = in_channel * kh * kw
    bound = 1.0 / jnp.sqrt(fan_in)
    key, kw_, kb_, km_, kv_ = jax.random.split(key, 5)
    w = jax.random.uniform(kw_, (out_channel, in_channel, kh, kw),
                           jnp.float32, -bound, bound)
    b = jax.random.uniform(kb_, (out_channel,), jnp.float32, -bound, bound)
    # BN: gamma=1, beta=0 (fresh module); non-trivial running stats to exercise folding.
    gamma = jnp.ones((out_channel,), jnp.float32)
    beta = jnp.zeros((out_channel,), jnp.float32)
    mean = 0.1 * jax.random.normal(km_, (out_channel,), jnp.float32)
    var = 1.0 + 0.1 * jax.random.uniform(kv_, (out_channel,), jnp.float32)
    return {"w": w, "b": b, "gamma": gamma, "beta": beta, "mean": mean, "var": var}


# --------------------------------- main --------------------------------------

if __name__ == "__main__":
    key = jax.random.PRNGKey(0)
    batch, in_channel, out_channel = 2, 4, 32
    H = W = 16
    kernel_size = (1, 1)
    stride = (1, 1)
    if_bn = True
    eps = 1e-5

    k_x, k_p = jax.random.split(key)
    x = jax.random.normal(k_x, (batch, in_channel, H, W), jnp.float32)
    params = init_conv_bn_params(k_p, in_channel, out_channel, kernel_size)

    # one-time parameter setup (fold BN + bias, cast weight to bf16)
    w_eff, b_eff = fold_conv_bn_params(params, if_bn=if_bn, eps=eps)

    out = conv2d_forward(x, w_eff, b_eff, kernel_size=kernel_size, stride=stride,
                         apply_relu=True)
    out = jax.block_until_ready(out)
    Ho = (H - kernel_size[0]) // stride[0] + 1
    Wo = (W - kernel_size[1]) // stride[1] + 1
    assert out.shape == (batch, out_channel, Ho, Wo), out.shape

    # pure-JAX f32 reference: conv -> eval-mode BN -> relu
    ref = jax.lax.conv_general_dilated(
        x, params["w"], window_strides=stride, padding="VALID",
        dimension_numbers=("NCHW", "OIHW", "NCHW"))
    ref = ref + params["b"][None, :, None, None]
    if if_bn:
        ref = (ref - params["mean"][None, :, None, None]) / jnp.sqrt(
            params["var"][None, :, None, None] + eps)
        ref = ref * params["gamma"][None, :, None, None] + params["beta"][None, :, None, None]
    ref = jnp.maximum(ref, 0.0)

    err = float(jnp.max(jnp.abs(out - ref)))
    # bf16 MXU inputs => looser tolerance than a pure-f32 path
    assert jnp.allclose(out, ref, atol=2e-2, rtol=2e-2), err

    print("KERNEL_OK")
</pallas_src>

<mosaic_0001>
module attributes {stable_mosaic.version = 11 : i64} {
  func.func @_conv_bn_act_kernel(%arg0: i32, %arg1: i32, %arg2: memref<1x4x256xf32, #tpu.memory_space<vmem>>, %arg3: memref<32x4xbf16, #tpu.memory_space<vmem>>, %arg4: memref<32x1xf32, #tpu.memory_space<vmem>>, %arg5: memref<1x32x256xf32, #tpu.memory_space<vmem>>) attributes {dimension_semantics = [#tpu.dimension_semantics<parallel>, #tpu.dimension_semantics<parallel>], iteration_bounds = array<i64: 2, 1>, scalar_prefetch = 0 : i64, scratch_operands = 0 : i64, tpu.core_type = #tpu.core_type<tc>, window_params = [{transform_indices = @transform_0, window_bounds = array<i64: 1, 4, 256>}, {pipeline_mode = #tpu.pipeline_mode<synchronous>, transform_indices = @transform_1, window_bounds = array<i64: 32, 4>}, {pipeline_mode = #tpu.pipeline_mode<synchronous>, transform_indices = @transform_2, window_bounds = array<i64: 32, 1>}, {transform_indices = @transform_3, window_bounds = array<i64: 1, 32, 256>}]} {
    %c0 = arith.constant 0 : index
    %c0_0 = arith.constant 0 : index
    %c0_1 = arith.constant 0 : index
    %0 = vector.load %arg2[%c0, %c0_0, %c0_1] : memref<1x4x256xf32, #tpu.memory_space<vmem>>, vector<1x4x256xf32>
    %1 = vector.shape_cast %0 : vector<1x4x256xf32> to vector<4x256xf32>
    %2 = arith.truncf %1 : vector<4x256xf32> to vector<4x256xbf16>
    %c0_2 = arith.constant 0 : index
    %c0_3 = arith.constant 0 : index
    %3 = vector.load %arg3[%c0_2, %c0_3] : memref<32x4xbf16, #tpu.memory_space<vmem>>, vector<32x4xbf16>
    %cst = arith.constant dense<0.000000e+00> : vector<32x256xf32>
    %4 = tpu.matmul %3, %2, %cst {dimension_numbers = #tpu.dot_dimension_numbers<[1], [0], [0], [1], [0, 0, 1, 1], [], []>} : vector<32x4xbf16>, vector<4x256xbf16>, vector<32x256xf32> -> vector<32x256xf32>
    %c0_4 = arith.constant 0 : index
    %c0_5 = arith.constant 0 : index
    %5 = vector.load %arg4[%c0_4, %c0_5] : memref<32x1xf32, #tpu.memory_space<vmem>>, vector<32x1xf32>
    %6 = vector.broadcast %5 : vector<32x1xf32> to vector<32x256xf32>
    %7 = arith.addf %4, %6 : vector<32x256xf32>
    %cst_6 = arith.constant 0.000000e+00 : f32
    %8 = vector.broadcast %cst_6 : f32 to vector<32x256xf32>
    %9 = arith.maximumf %7, %8 : vector<32x256xf32>
    %c0_7 = arith.constant 0 : index
    %c0_8 = arith.constant 0 : index
    %c0_9 = arith.constant 0 : index
    %10 = vector.load %arg5[%c0_7, %c0_8, %c0_9] : memref<1x32x256xf32, #tpu.memory_space<vmem>>, vector<1x32x256xf32>
    %11 = vector.shape_cast %10 : vector<1x32x256xf32> to vector<32x256xf32>
    %12 = vector.shape_cast %9 : vector<32x256xf32> to vector<1x32x256xf32>
    tpu.vector_store %arg5[%c0_7, %c0_8, %c0_9], %12 {strides = array<i32>} : memref<1x32x256xf32, #tpu.memory_space<vmem>>, vector<1x32x256xf32>,
    return
  }
  func.func @transform_0(%arg0: i32, %arg1: i32) -> (i32, i32, i32) {
    %c0_i32 = arith.constant 0 : i32
    %c0_i32_0 = arith.constant 0 : i32
    return %arg0, %c0_i32, %arg1 : i32, i32, i32
  }
  func.func @transform_1(%arg0: i32, %arg1: i32) -> (i32, i32) {
    %c0_i32 = arith.constant 0 : i32
    %c0_i32_0 = arith.constant 0 : i32
    %c0_i32_1 = arith.constant 0 : i32
    return %c0_i32, %c0_i32_0 : i32, i32
  }
  func.func @transform_2(%arg0: i32, %arg1: i32) -> (i32, i32) {
    %c0_i32 = arith.constant 0 : i32
    %c0_i32_0 = arith.constant 0 : i32
    %c0_i32_1 = arith.constant 0 : i32
    return %c0_i32, %c0_i32_0 : i32, i32
  }
  func.func @transform_3(%arg0: i32, %arg1: i32) -> (i32, i32, i32) {
    %c0_i32 = arith.constant 0 : i32
    %c0_i32_0 = arith.constant 0 : i32
    return %arg0, %c0_i32, %arg1 : i32, i32, i32
  }
}

</mosaic_0001>

<bundles_post_ra>
// kernel: conv2d_forward.1
= control target key start
LH: loop header
LB: loop body
LE: loop exit
PB: predicated region body
PF: predicated region fallthrough
CT: control target
= control target key end

     0   :  { %s520_s12 = smov 0   ;;  %s522_s13 = smov 0   ;;  %s575_s0 = inlined_call_operand.vmem [shape: f32[2,4,256], index: 0, kind: input, shape index: {}]   ;;  %s576_s1 = inlined_call_operand.vmem [shape: bf16[32,4], index: 1, kind: input, shape index: {}]   ;;  %s577_s2 = inlined_call_operand.vmem [shape: f32[32,1], index: 2, kind: input, shape index: {}]   ;;  %s578_s3 = inlined_call_operand.vmem [shape: f32[2,32,256], index: 3, kind: output, shape index: {}]  }
   0x1   :  { %s524_s14 = smov 0  }
   0x2 LB: > { %s25_s15 = sadd.s32 1, %s493_s13  ;;  %p429_p0 = scmp.ge.s32.totalorder %s497_s14, 1  ;;  %s497_s14 = sphi %s524_s14, %s13_s14   ;;  %s493_s13 = sphi %s522_s13, %s580_s13   ;;  %s489_s12 = sphi %s520_s12, %s579_s12  }
   0x3   : > { %p27_p1 = scmp.ge.s32.totalorder %s25_s15, 2  ;;  %p158_p2 = scmp.lt.s32.totalorder %s497_s14, 3 }
   0x5   : > { %s582_s15 = smov (%p27_p1, %s25_s15), 0  ;;  %p159_p3 = pnand %p429_p0, %p158_p2 }
   0x6   : > { %p191_p4 = scmp.lt.s32.totalorder (!%p159_p3), %s489_s12, 1 }
   0x7   : > { %162 = sbr.rel (%p159_p3) target bundleno = 228 (0xe4), region = 32 }
   0xc   : > { %v499_v0 = vmov 0   ;;  %s584_s12 = smov (!%p191_p4, %s489_s12), 1  ;;  %v223_v1 = vld [vmem:[%s577_s2 + $0x10] sm:$0xff]  ;;  %v221_v2 = vld [vmem:[%s577_s2] sm:$0xff]  ;;  %v224_v3 = vld [vmem:[%s577_s2 + $0x18] sm:$0xff]  ;;  %vm262_vm0 = vcmask 1041408  }
   0xd   : > { %301 = vmatprep.mubr.bf16.mxu0 %v499_v0  ;;  %311 = vmatprep.mubr.bf16.mxu1 %v499_v0  ;;  %s441_s20 = sshll.u32 %s584_s12, 3  ;;  %v222_v4 = vld [vmem:[%s577_s2 + $0x8] sm:$0xff]  ;;  %v473_v10 = vld [vmem:[%s576_s1] sm:$0xff]   ;;  %vm255_vm1 = vcmask 31744   ;;  %s442_s5 = sshll.u32 %s584_s12, 6 }
   0xe   : > { %471 = vset.pattern.permute.xlu1 %v499_v0  ;;  %470 = vset.pattern.permute.xlu0 %v499_v0  ;;  %s198_s27 = scalar_lea.vmem %s575_s0, %s441_s20  ;;  %v474_v11 = vld [vmem:[%s576_s1 + $0x8] sm:$0xff]   ;;  %s208_s8 = scalar_lea.vmem %s578_s3, %s442_s5 }
   0xf   : > { %237 = vperm.xlu1 %471, %v223_v1   ;;  %227 = vperm.xlu0 %470, %v221_v2   ;;  %v211_v5 = vld [vmem:[%s198_s27] sm:$0xff] }
  0x10   : > { %v213_v6 = vcombine.high %v211_v5, %v211_v5  ;;  %v215_v7 = vpack.c.bf16 %v211_v5, %v211_v5 }
  0x12   : > { %v216_v8 = vpack.c.bf16 %v213_v6, %v213_v6  ;;  %v264_v9 = vsel %vm262_vm0, %v215_v7, 0 }
  0x13   : > { %242 = vperm.xlu1 %471, %v224_v3   ;;  %232 = vperm.xlu0 %470, %v222_v4  }
  0x14   : > { %436 = vmatprep.subr.msk.bf16.mxu0 %vm262_vm0, %v216_v8  ;;  %443 = vmatprep.subr.msk.bf16.mxu1 %vm262_vm0, %v216_v8 }
  0x15   : > { %284 = vmatpush1.bf16.msra.mxu0 %v264_v9  ;;  %444 = vmatpush1.bf16.msra.mxu1 %v264_v9 }
  0x18   : > { %437 = vmatmul.mubr.msk.bf16.vlgmr.msra.gmra.mxu0 %vm255_vm1, %v473_v10  ;;  %438 = vmatmul.mubr.msk.bf16.vlgmr.msra.gmra.mxu1 %vm255_vm1, %v474_v11 }
  0x8a   : > { %v238_v12 = vpop.permute.xlu1 %237  ;;  %v228_v13 = vpop.permute.xlu0 %227 }
  0x8e   : > { %v243_v22 = vpop.permute.xlu1 %242  ;;  %v233_v23 = vpop.permute.xlu0 %232 }
  0xd8   : > { %v303_v14 = vpop.f32.mrf.mxu0  ;;  %v313_v15 = vpop.f32.mrf.mxu1 }
  0xd9   : > { %v304_v16 = vadd.f32 %v303_v14, %v228_v13  ;;  %v314_v17 = vadd.f32 %v313_v15, %v238_v12 }
  0xda   : > { %v305_v18 = vpop.f32.mrf.mxu0  ;;  %v315_v19 = vpop.f32.mrf.mxu1 }
  0xdb   : > { %v322_v20 = vmax.f32 %v304_v16, 0.0  ;;  %v326_v21 = vmax.f32 %v314_v17, 0.0  ;;  %v306_v24 = vadd.f32 %v305_v18, %v228_v13  ;;  %v316_v25 = vadd.f32 %v315_v19, %v238_v12 }
  0xdc   : > { %v307_v26 = vpop.f32.mrf.mxu0  ;;  %v317_v27 = vpop.f32.mrf.mxu1 }
  0xdd   : > { %330 = vst [vmem:[%s208_s8] sm:$0xff] %v322_v20  ;;  %334 = vst [vmem:[%s208_s8 + $0x20] sm:$0xff] %v326_v21  ;;  %v323_v28 = vmax.f32 %v306_v24, 0.0  ;;  %v327_v29 = vmax.f32 %v316_v25, 0.0  ;;  %v308_v30 = vadd.f32 %v307_v26, %v233_v23  ;;  %v318_v31 = vadd.f32 %v317_v27, %v243_v22 }
  0xde   : > { %v309_v32 = vpop.f32.mrf.mxu0  ;;  %v319_v33 = vpop.f32.mrf.mxu1 }
  0xdf   : > { %331 = vst [vmem:[%s208_s8 + $0x8] sm:$0xff] %v323_v28  ;;  %335 = vst [vmem:[%s208_s8 + $0x28] sm:$0xff] %v327_v29  ;;  %v324_v34 = vmax.f32 %v308_v30, 0.0  ;;  %v328_v35 = vmax.f32 %v318_v31, 0.0  ;;  %v310_v36 = vadd.f32 %v309_v32, %v233_v23  ;;  %v320_v37 = vadd.f32 %v319_v33, %v243_v22 }
  0xe1   : > { %332 = vst [vmem:[%s208_s8 + $0x10] sm:$0xff] %v324_v34  ;;  %336 = vst [vmem:[%s208_s8 + $0x30] sm:$0xff] %v328_v35  ;;  %v325_v38 = vmax.f32 %v310_v36, 0.0  ;;  %v329_v39 = vmax.f32 %v320_v37, 0.0 }
  0xe3   : > { %333 = vst [vmem:[%s208_s8 + $0x18] sm:$0xff] %v325_v38  ;;  %337 = vst [vmem:[%s208_s8 + $0x38] sm:$0xff] %v329_v39 }
  0xe4 PF: > { %s13_s14 = sadd.s32 1, %s497_s14   ;;  %s579_s12 = smov %s493_s13 }
  0xe5   : > { %p10_p5 = scmp.ge.s32.totalorder %s13_s14, 4   ;;  %s580_s13 = smov %s582_s15 }
  0xe7   :  { %12 = sbr.rel (!%p10_p5) target bundleno = 2 (0x2), region = 62 }

</bundles_post_ra>
